<compile_context>
chip_gen: v7x
topology: tpu7x:2x2x1
jax: 0.10.0
libtpu: 0.0.40
codegen_flags: <defaults>
</compile_context>

<pallas_src>
import jax
import jax.numpy as jnp
from jax.experimental import pallas as pl
from jax.experimental.pallas import tpu as pltpu


def _weighted_ce_partials_kernel(x_ref, tgt_ref, nll_ref, cnt_ref, nll_acc, cnt_acc):
    """Accumulate per-class NLL sums / counts over the inner spatial grid axis.

    x_ref:   (C, T) logits tile    (classes on sublanes, spatial items on lanes)
    tgt_ref: (1, T) integer class ids (sentinel outside [0, C) marks padding)
    nll_ref: (C, 1) f32 output block (written once, at the last inner step)
    cnt_ref: (C, 1) i32 output block
    nll_acc/cnt_acc: (C, 1) VMEM scratch accumulators
    """
    si = pl.program_id(2)

    @pl.when(si == 0)
    def _():
        nll_acc[...] = jnp.zeros_like(nll_acc)
        cnt_acc[...] = jnp.zeros_like(cnt_acc)

    C, T = x_ref.shape
    x = x_ref[...].astype(jnp.float32)               # native-dtype load, f32 math

    # log_softmax over the class (sublane) axis.
    m = jnp.max(x, axis=0, keepdims=True)            # (1, T)
    z = x - m
    lse = jnp.log(jnp.sum(jnp.exp(z), axis=0, keepdims=True))
    logp = z - lse                                    # (C, T)

    cls = jax.lax.broadcasted_iota(jnp.int32, (C, T), 0)
    tgt = tgt_ref[...].astype(jnp.int32)              # (1, T) -> broadcast over sublanes
    onehot = cls == tgt                                # padded lanes: all-false

    nll_acc[...] += jnp.sum(jnp.where(onehot, -logp, 0.0), axis=1, keepdims=True)
    cnt_acc[...] += jnp.sum(onehot.astype(jnp.int32), axis=1, keepdims=True)

    @pl.when(si == pl.num_programs(2) - 1)
    def _():
        nll_ref[...] = nll_acc[...]
        cnt_ref[...] = cnt_acc[...]


def _plan_tiles(HW, C, x_itemsize, tgt_itemsize, N):
    """Pick (t_hw, s_outer, s_inner).

    Aims for ~2-4 MiB of logits per block with double-buffered inputs
    (logits + targets) <= ~12 MiB (safe on v5e), keeps >=2 parallel blocks for
    v7x megacore when the spatial extent allows, and puts remaining spatial
    blocks on an inner accumulation axis.
    """
    LANE = 128
    hw128 = -(-HW // LANE) * LANE

    per_lane_db = 2 * (C * x_itemsize + tgt_itemsize)        # double-buffered inputs
    t_cap = min((12 << 20) // per_lane_db,                    # total-input budget
                (4 << 20) // max(1, C * x_itemsize))          # logits-block budget
    t_cap = max(LANE, (t_cap // LANE) * LANE)
    t_hw = min(t_cap, hw128)

    # v7x has 2 TensorCores: keep >=2 parallel spatial blocks when N == 1.
    if N == 1 and hw128 >= 2 * LANE and t_hw >= hw128:
        t_hw = -(-(hw128 // 2) // LANE) * LANE

    S = -(-hw128 // t_hw)
    s_outer = min(S, max(1, -(-4 // N)))       # aim for >=4 parallel blocks total
    s_inner = -(-S // s_outer)
    return t_hw, s_outer, s_inner


def label_weighted_cross_entropy_loss(pred, target, reduction='mean'):
    """pred: (N, C, *spatial) logits; target: (N, *spatial) integer class ids."""
    N, C = pred.shape[0], pred.shape[1]
    HW = 1
    for d in pred.shape[2:]:
        HW *= d

    x = pred.reshape(N, C, HW)                        # free merge of trailing dims
    tgt = target.reshape(N, 1, HW)
    if not jnp.issubdtype(tgt.dtype, jnp.integer):
        tgt = tgt.astype(jnp.int32)

    t_hw, s_outer, s_inner = _plan_tiles(HW, C, x.dtype.itemsize, tgt.dtype.itemsize, N)
    hw_total = t_hw * s_outer * s_inner
    pad = hw_total - HW
    if pad:
        x = jnp.pad(x, ((0, 0), (0, 0), (0, pad)))
        # Sentinel class id that never matches iota in [0, C).
        if jnp.issubdtype(tgt.dtype, jnp.signedinteger):
            sentinel = -1
        else:
            sentinel = jnp.iinfo(tgt.dtype).max
        tgt = jnp.pad(tgt, ((0, 0), (0, 0), (0, pad)), constant_values=sentinel)

    nll_parts, cnt_parts = pl.pallas_call(
        _weighted_ce_partials_kernel,
        out_shape=(
            jax.ShapeDtypeStruct((N, s_outer, C, 1), jnp.float32),
            jax.ShapeDtypeStruct((N, s_outer, C, 1), jnp.int32),
        ),
        grid=(N, s_outer, s_inner),
        in_specs=[
            pl.BlockSpec((None, C, t_hw), lambda n, so, si: (n, 0, so * s_inner + si)),
            pl.BlockSpec((None, 1, t_hw), lambda n, so, si: (n, 0, so * s_inner + si)),
        ],
        out_specs=(
            pl.BlockSpec((None, None, C, 1), lambda n, so, si: (n, so, 0, 0)),
            pl.BlockSpec((None, None, C, 1), lambda n, so, si: (n, so, 0, 0)),
        ),
        scratch_shapes=[
            pltpu.VMEM((C, 1), jnp.float32),
            pltpu.VMEM((C, 1), jnp.int32),
        ],
        compiler_params=pltpu.CompilerParams(
            dimension_semantics=("parallel", "parallel", "arbitrary"),
            vmem_limit_bytes=32 << 20),
    )(x, tgt)

    # Tiny O(C) epilogue in plain JAX: inverse-frequency weights + reduction.
    nll_c = jnp.sum(nll_parts, axis=(0, 1))[:, 0]                      # (C,)
    cnt_c = jnp.sum(cnt_parts, axis=(0, 1))[:, 0].astype(jnp.float32)  # exact int32 sum

    inv = 1.0 / cnt_c   # classes absent from target -> inf -> NaN loss, matching torch 1/bincount
    w = inv / jnp.sum(inv)

    num = jnp.sum(w * nll_c)                          # sum_i weight[target_i] * nll_i
    if reduction == 'mean':
        den = jnp.sum(w * cnt_c)                      # sum_i weight[target_i]
        return num / den
    if reduction == 'sum':
        return num
    # TODO(synk): reduction='none' (per-item weighted nll output) not implemented.
    raise ValueError(f"unsupported reduction: {reduction}")


def _reference_loss(pred, target, reduction):
    C = pred.shape[1]
    tgt = target.reshape(-1).astype(jnp.int32)
    counts = jnp.bincount(tgt, length=C).astype(jnp.float32)
    w = 1.0 / counts
    w = w / jnp.sum(w)
    logp = jax.nn.log_softmax(pred.astype(jnp.float32), axis=1)
    logp_flat = jnp.moveaxis(logp, 1, -1).reshape(-1, C)
    nll = -jnp.take_along_axis(logp_flat, tgt[:, None], axis=1)[:, 0]
    wi = w[tgt]
    num = jnp.sum(wi * nll)
    return num / jnp.sum(wi) if reduction == 'mean' else num


if __name__ == "__main__":
    key = jax.random.PRNGKey(0)
    k1, k2, k3, k4 = jax.random.split(key, 4)

    # Primary check: NCHW f32 logits, int32 targets, 'mean'.
    N, C, H, W = 2, 4, 16, 16
    pred = jax.random.normal(k1, (N, C, H, W), jnp.float32)
    target = jax.random.randint(k2, (N, H, W), 0, C, jnp.int32)
    loss = jax.block_until_ready(label_weighted_cross_entropy_loss(pred, target, 'mean'))
    ref = _reference_loss(pred, target, 'mean')
    assert jnp.allclose(loss, ref, rtol=1e-5, atol=1e-5), (loss, ref)

    # Secondary check: exercises lane padding (HW=63), sublane-padded C=3,
    # bf16 logits, int8 targets, 'sum' reduction.
    N2, C2, H2, W2 = 1, 3, 7, 9
    pred2 = jax.random.normal(k3, (N2, C2, H2, W2), jnp.bfloat16)
    target2 = jax.random.randint(k4, (N2, H2, W2), 0, C2, jnp.int8)
    loss2 = jax.block_until_ready(label_weighted_cross_entropy_loss(pred2, target2, 'sum'))
    ref2 = _reference_loss(pred2, target2, 'sum')
    assert jnp.allclose(loss2, ref2, rtol=1e-4, atol=1e-4), (loss2, ref2)

    print("KERNEL_OK")
</pallas_src>

<mosaic_0001>
module attributes {stable_mosaic.version = 11 : i64} {
  func.func @_weighted_ce_partials_kernel(%arg0: i32, %arg1: i32, %arg2: i32, %arg3: memref<1x4x256xf32, #tpu.memory_space<vmem>>, %arg4: memref<1x1x256xi32, #tpu.memory_space<vmem>>, %arg5: memref<1x1x4x1xf32, #tpu.memory_space<vmem>>, %arg6: memref<1x1x4x1xi32, #tpu.memory_space<vmem>>, %arg7: memref<4x1xf32, #tpu.memory_space<vmem>>, %arg8: memref<4x1xi32, #tpu.memory_space<vmem>>) attributes {dimension_semantics = [#tpu.dimension_semantics<parallel>, #tpu.dimension_semantics<parallel>, #tpu.dimension_semantics<arbitrary>], iteration_bounds = array<i64: 2, 1, 1>, scalar_prefetch = 0 : i64, scratch_operands = 2 : i64, tpu.core_type = #tpu.core_type<tc>, window_params = [{transform_indices = @transform_0, window_bounds = array<i64: 1, 4, 256>}, {transform_indices = @transform_1, window_bounds = array<i64: 1, 1, 256>}, {transform_indices = @transform_2, window_bounds = array<i64: 1, 1, 4, 1>}, {transform_indices = @transform_3, window_bounds = array<i64: 1, 1, 4, 1>}]} {
    %c0_i32 = arith.constant 0 : i32
    %0 = arith.cmpi eq, %arg2, %c0_i32 : i32
    %1 = arith.extui %0 : i1 to i32
    %c0_i32_0 = arith.constant 0 : i32
    %2 = arith.cmpi ne, %1, %c0_i32_0 : i32
    scf.if %2 {
      %cst_21 = arith.constant 0.000000e+00 : f32
      %38 = vector.broadcast %cst_21 : f32 to vector<4x1xf32>
      %c0_22 = arith.constant 0 : index
      %c0_23 = arith.constant 0 : index
      %39 = vector.load %arg7[%c0_22, %c0_23] : memref<4x1xf32, #tpu.memory_space<vmem>>, vector<4x1xf32>
      tpu.vector_store %arg7[%c0_22, %c0_23], %38 {strides = array<i32>} : memref<4x1xf32, #tpu.memory_space<vmem>>, vector<4x1xf32>,
      %c0_i32_24 = arith.constant 0 : i32
      %40 = vector.broadcast %c0_i32_24 : i32 to vector<4x1xi32>
      %c0_25 = arith.constant 0 : index
      %c0_26 = arith.constant 0 : index
      %41 = vector.load %arg8[%c0_25, %c0_26] : memref<4x1xi32, #tpu.memory_space<vmem>>, vector<4x1xi32>
      tpu.vector_store %arg8[%c0_25, %c0_26], %40 {strides = array<i32>} : memref<4x1xi32, #tpu.memory_space<vmem>>, vector<4x1xi32>,
    } else {
    }
    %c0 = arith.constant 0 : index
    %c0_1 = arith.constant 0 : index
    %c0_2 = arith.constant 0 : index
    %3 = vector.load %arg3[%c0, %c0_1, %c0_2] : memref<1x4x256xf32, #tpu.memory_space<vmem>>, vector<1x4x256xf32>
    %4 = vector.shape_cast %3 : vector<1x4x256xf32> to vector<4x256xf32>
    %cst = arith.constant dense<0xFF800000> : vector<256xf32>
    %5 = vector.multi_reduction <maximumf>, %4, %cst [0] : vector<4x256xf32> to vector<256xf32>
    %6 = vector.shape_cast %5 : vector<256xf32> to vector<1x256xf32>
    %7 = vector.broadcast %6 : vector<1x256xf32> to vector<4x256xf32>
    %8 = arith.subf %4, %7 : vector<4x256xf32>
    %9 = math.exp %8 : vector<4x256xf32>
    %cst_3 = arith.constant dense<0.000000e+00> : vector<256xf32>
    %10 = vector.multi_reduction <add>, %9, %cst_3 [0] : vector<4x256xf32> to vector<256xf32>
    %11 = vector.shape_cast %10 : vector<256xf32> to vector<1x256xf32>
    %12 = math.log %11 : vector<1x256xf32>
    %13 = vector.broadcast %12 : vector<1x256xf32> to vector<4x256xf32>
    %14 = arith.subf %8, %13 : vector<4x256xf32>
    %15 = tpu.iota {dimensions = array<i32: 0>} : vector<4x256xi32>
    %c0_4 = arith.constant 0 : index
    %c0_5 = arith.constant 0 : index
    %c0_6 = arith.constant 0 : index
    %16 = vector.load %arg4[%c0_4, %c0_5, %c0_6] : memref<1x1x256xi32, #tpu.memory_space<vmem>>, vector<1x1x256xi32>
    %17 = vector.shape_cast %16 : vector<1x1x256xi32> to vector<1x256xi32>
    %18 = vector.broadcast %17 : vector<1x256xi32> to vector<4x256xi32>
    %19 = arith.cmpi eq, %15, %18 : vector<4x256xi32>
    %c0_7 = arith.constant 0 : index
    %c0_8 = arith.constant 0 : index
    %20 = vector.load %arg7[%c0_7, %c0_8] : memref<4x1xf32, #tpu.memory_space<vmem>>, vector<4x1xf32>
    %cst_9 = arith.constant 0.000000e+00 : f32
    %21 = vector.broadcast %cst_9 : f32 to vector<4x256xf32>
    %22 = arith.subf %21, %14 : vector<4x256xf32>
    %cst_10 = arith.constant 0.000000e+00 : f32
    %23 = vector.broadcast %cst_10 : f32 to vector<4x256xf32>
    %24 = arith.select %19, %22, %23 : vector<4x256xi1>, vector<4x256xf32>
    %cst_11 = arith.constant dense<0.000000e+00> : vector<4xf32>
    %25 = vector.multi_reduction <add>, %24, %cst_11 [1] : vector<4x256xf32> to vector<4xf32>
    %26 = vector.shape_cast %25 : vector<4xf32> to vector<4x1xf32>
    %27 = arith.addf %20, %26 : vector<4x1xf32>
    %c0_12 = arith.constant 0 : index
    %c0_13 = arith.constant 0 : index
    %28 = vector.load %arg7[%c0_12, %c0_13] : memref<4x1xf32, #tpu.memory_space<vmem>>, vector<4x1xf32>
    tpu.vector_store %arg7[%c0_12, %c0_13], %27 {strides = array<i32>} : memref<4x1xf32, #tpu.memory_space<vmem>>, vector<4x1xf32>,
    %c0_14 = arith.constant 0 : index
    %c0_15 = arith.constant 0 : index
    %29 = vector.load %arg8[%c0_14, %c0_15] : memref<4x1xi32, #tpu.memory_space<vmem>>, vector<4x1xi32>
    %30 = arith.extui %19 : vector<4x256xi1> to vector<4x256xi32>
    %cst_16 = arith.constant dense<0> : vector<4xi32>
    %31 = vector.multi_reduction <add>, %30, %cst_16 [1] : vector<4x256xi32> to vector<4xi32>
    %32 = vector.shape_cast %31 : vector<4xi32> to vector<4x1xi32>
    %33 = arith.addi %29, %32 : vector<4x1xi32>
    %c0_17 = arith.constant 0 : index
    %c0_18 = arith.constant 0 : index
    %34 = vector.load %arg8[%c0_17, %c0_18] : memref<4x1xi32, #tpu.memory_space<vmem>>, vector<4x1xi32>
    tpu.vector_store %arg8[%c0_17, %c0_18], %33 {strides = array<i32>} : memref<4x1xi32, #tpu.memory_space<vmem>>, vector<4x1xi32>,
    %c0_i32_19 = arith.constant 0 : i32
    %35 = arith.cmpi eq, %arg2, %c0_i32_19 : i32
    %36 = arith.extui %35 : i1 to i32
    %c0_i32_20 = arith.constant 0 : i32
    %37 = arith.cmpi ne, %36, %c0_i32_20 : i32
    scf.if %37 {
      %c0_21 = arith.constant 0 : index
      %c0_22 = arith.constant 0 : index
      %38 = vector.load %arg7[%c0_21, %c0_22] : memref<4x1xf32, #tpu.memory_space<vmem>>, vector<4x1xf32>
      %c0_23 = arith.constant 0 : index
      %c0_24 = arith.constant 0 : index
      %c0_25 = arith.constant 0 : index
      %c0_26 = arith.constant 0 : index
      %39 = vector.load %arg5[%c0_23, %c0_24, %c0_25, %c0_26] : memref<1x1x4x1xf32, #tpu.memory_space<vmem>>, vector<1x1x4x1xf32>
      %40 = vector.shape_cast %39 : vector<1x1x4x1xf32> to vector<4x1xf32>
      %41 = vector.shape_cast %38 : vector<4x1xf32> to vector<1x1x4x1xf32>
      tpu.vector_store %arg5[%c0_23, %c0_24, %c0_25, %c0_26], %41 {strides = array<i32>} : memref<1x1x4x1xf32, #tpu.memory_space<vmem>>, vector<1x1x4x1xf32>,
      %c0_27 = arith.constant 0 : index
      %c0_28 = arith.constant 0 : index
      %42 = vector.load %arg8[%c0_27, %c0_28] : memref<4x1xi32, #tpu.memory_space<vmem>>, vector<4x1xi32>
      %c0_29 = arith.constant 0 : index
      %c0_30 = arith.constant 0 : index
      %c0_31 = arith.constant 0 : index
      %c0_32 = arith.constant 0 : index
      %43 = vector.load %arg6[%c0_29, %c0_30, %c0_31, %c0_32] : memref<1x1x4x1xi32, #tpu.memory_space<vmem>>, vector<1x1x4x1xi32>
      %44 = vector.shape_cast %43 : vector<1x1x4x1xi32> to vector<4x1xi32>
      %45 = vector.shape_cast %42 : vector<4x1xi32> to vector<1x1x4x1xi32>
      tpu.vector_store %arg6[%c0_29, %c0_30, %c0_31, %c0_32], %45 {strides = array<i32>} : memref<1x1x4x1xi32, #tpu.memory_space<vmem>>, vector<1x1x4x1xi32>,
    } else {
    }
    return
  }
  func.func @transform_0(%arg0: i32, %arg1: i32, %arg2: i32) -> (i32, i32, i32) {
    %c1_i32 = arith.constant 1 : i32
    %0 = arith.muli %arg1, %c1_i32 : i32
    %1 = arith.addi %0, %arg2 : i32
    %c0_i32 = arith.constant 0 : i32
    %c0_i32_0 = arith.constant 0 : i32
    return %arg0, %c0_i32, %1 : i32, i32, i32
  }
  func.func @transform_1(%arg0: i32, %arg1: i32, %arg2: i32) -> (i32, i32, i32) {
    %c1_i32 = arith.constant 1 : i32
    %0 = arith.muli %arg1, %c1_i32 : i32
    %1 = arith.addi %0, %arg2 : i32
    %c0_i32 = arith.constant 0 : i32
    %c0_i32_0 = arith.constant 0 : i32
    return %arg0, %c0_i32, %1 : i32, i32, i32
  }
  func.func @transform_2(%arg0: i32, %arg1: i32, %arg2: i32) -> (i32, i32, i32, i32) {
    %c0_i32 = arith.constant 0 : i32
    %c0_i32_0 = arith.constant 0 : i32
    %c0_i32_1 = arith.constant 0 : i32
    return %arg0, %arg1, %c0_i32, %c0_i32_0 : i32, i32, i32, i32
  }
  func.func @transform_3(%arg0: i32, %arg1: i32, %arg2: i32) -> (i32, i32, i32, i32) {
    %c0_i32 = arith.constant 0 : i32
    %c0_i32_0 = arith.constant 0 : i32
    %c0_i32_1 = arith.constant 0 : i32
    return %arg0, %arg1, %c0_i32, %c0_i32_0 : i32, i32, i32, i32
  }
}

</mosaic_0001>

<bundles_post_ra>
// kernel: tpu_custom_call.1
= control target key start
LH: loop header
LB: loop body
LE: loop exit
PB: predicated region body
PF: predicated region fallthrough
CT: control target
= control target key end

     0   :  { %9 = vsyncpa [#allocation5], 0  ;;  %s996_s0 = inlined_call_operand.hbm [shape: f32[2,4,256], index: 0, kind: input, shape index: {}]   ;;  %s997_s1 = inlined_call_operand.hbm [shape: s32[2,1,256], index: 1, kind: input, shape index: {}]   ;;  %s998_s2 = inlined_call_operand.vmem [shape: f32[2,1,4,1], index: 2, kind: output, shape index: {0}]   ;;  %s999_s3 = inlined_call_operand.vmem [shape: s32[2,1,4,1], index: 3, kind: output, shape index: {1}]  }
   0x1   :  { %11 = vsyncpa [#allocation5 + $0x1], 0 }
   0x2   :  { %12 = vsyncpa [#allocation7], 0 }
   0x3   :  { %14 = vsyncpa [#allocation7 + $0x1], 0  ;;  %s789_s12 = smov 0   ;;  %s791_s13 = smov 0  }
   0x4   :  { %s793_s14 = smov 0   ;;  %s795_s15 = smov 0  }
   0x5   :  { %s797_s16 = smov 0   ;;  %s799_s17 = smov 0  }
   0x6 LB: > { %s561_s18 = sadd.s32 4294967295, %s763_s17   ;;  %s39_s19 = sadd.s32 1, %s759_s16  ;;  %s763_s17 = sphi %s799_s17, %s20_s17   ;;  %s759_s16 = sphi %s797_s16, %s1013_s16   ;;  %s755_s15 = sphi %s795_s15, %s1012_s15   ;;  %s751_s14 = sphi %s793_s14, %s1011_s14   ;;  %s747_s13 = sphi %s791_s13, %s1010_s13   ;;  %s743_s12 = sphi %s789_s12, %s1009_s12  }
   0x7   : > { %p41_p0 = scmp.ge.s32.totalorder %s39_s19, 2  ;;  %s50_s20 = sadd.s32 1, %s751_s14 }
   0x8   : > { %p57_p1 = scmp.ne.s32.totalorder %s751_s14, %s747_s13  ;;  %p58_p2 = scmp.eq.s32.totalorder %s763_s17, 0 }
   0x9   : > { %s1015_s19 = smov (%p41_p0, %s39_s19), 0  ;;  %p63_p4 = scmp.ne.s32.totalorder %s747_s13, %s743_s12 }
   0xa   : > { %p825_p3 = por %p58_p2, %p57_p1  ;;  %s45_s22 = ssub.s32 %s759_s16, %s1015_s19 }
   0xb   : > { %p64_p5 = scmp.eq.s32.totalorder %s561_s18, 0  ;;  %p48_p6 = scmp.eq.s32.totalorder %s45_s22, 0 }
   0xc   : > { %p591_p8 = scmp.lt.s32.totalorder %s763_s17, 2  ;;  %s841_s25 = sand.u32 1, %s751_s14  }
   0xd   : > { %p832_p7 = por %p64_p5, %p63_p4  ;;  %s578_s26 = sshll.u32 %s759_s16, 7 }
   0xe   : > { %s838_s24 = scalar_select %p48_p6, %s751_s14, %s50_s20  }
   0xf   : > { %s1002_s23 = scalar_select %p832_p7, 1, 0 }
  0x10   : > { %s565_s27 = sshll.u32 %s841_s25, 3  ;;  %s848_s30 = scalar_lea.hbm %s996_s0, %s578_s26 }
  0x11   : > { %s177_s4 = scalar_lea.vmem [#allocation4], %s565_s27  ;;  %p852_p9 = pnand %p591_p8, %p825_p3 }
  0x12   : > { %s188_s5 = sshll.u32 %s177_s4, 4  ;;  %s174_s7 = scalar_lea.sflag [#allocation5], %s841_s25  ;;  %s856_s5 = int_to_ptr.vmem [resolvable:$true] %s188_s5 }
  0x13   : > { %s649_s8 = scalar_lea.hbm %s848_s30, 128  ;;  %p651_p13 = pneg %p852_p9 }
  0x14   : > { %p650_p12 = scmp.ne.s32.totalorder %s848_s30, %s649_s8  ;;  %s654_s11 = scalar_lea.hbm %s996_s0, 256 }
  0x15   : > { %p655_p2 = scmp.lt.u32.totalorder %s848_s30, %s996_s0  ;;  %p656_p3 = scmp.lt.u32.totalorder %s654_s11, %s649_s8 }
  0x16   : > { %p652_p0 = pnand %p651_p13, %p650_p12  ;;  %p658_p5 = scmp.lt.u32.totalorder %s649_s8, %s848_s30 }
  0x17   : > { %p657_p4 = por %p656_p3, %p655_p2 }
  0x18   : > { %p653_p1 = pneg %p652_p0 }
  0x19   : > { %p659_p6 = por %p658_p5, %p657_p4 }
  0x1b   : > { %p660_p8 = pnand %p659_p6, %p653_p1 }
  0x1d   : > { %663 = shalt.err (!%p660_p8)
}
  0x1e   : > { %s664_s20 = scalar_lea.vmem %s856_s5, 128  ;;  %s765_s21 = smov [#allocation4]  }
  0x1f   : > { %p665_p12 = scmp.ne.s32.totalorder %s856_s5, %s664_s20  ;;  %s669_s22 = sshll.u32 %s765_s21, 4  ;;  %s670_s22 = int_to_ptr.vmem [resolvable:$false] %s669_s22 }
  0x20   : > { %s671_s26 = scalar_lea.vmem %s670_s22, 256  ;;  %p672_p11 = scmp.lt.s32.totalorder %s856_s5, %s670_s22 }
  0x21   : > { %p667_p0 = pnand %p665_p12, %p651_p13  ;;  %p673_p2 = scmp.lt.s32.totalorder %s671_s26, %s664_s20 }
  0x23   : > { %p668_p10 = pneg %p667_p0  ;;  %p674_p3 = por %p673_p2, %p672_p11 }
  0x25   : > { %p675_p4 = pnand %p674_p3, %p668_p10 }
  0x27   : > { %678 = shalt.err (!%p675_p4)
}
  0x28   : > { %587 = dma.hbm_to_vmem [thread:$0]  (!%p852_p9), %s848_s30, 128, %s856_s5, %s174_s7  }
  0x29   : > { %p1004_p1 = scmp.lt.s32.totalorder %s763_s17, 3  ;;  %p1005_p5 = scmp.ge.s32.totalorder %s763_s17, 1 }
  0x2a   : > { %s568_s28 = sshll.u32 %s841_s25, 1  ;;  %s579_s29 = sshll.u32 %s759_s16, 5 }
  0x2b   : > { %p890_p6 = pnand %p1005_p5, %p1004_p1  ;;  %s899_s9 = scalar_lea.hbm %s997_s1, %s579_s29 }
  0x2c   : > { %s199_s10 = scalar_lea.vmem [#allocation6], %s568_s28  ;;  %s196_s30 = scalar_lea.sflag [#allocation7], %s841_s25 }
  0x2d   : > { %s1006_s27 = scalar_select %p890_p6, 1, 0 }
  0x2e   : > { %s210_s11 = sshll.u32 %s199_s10, 4  ;;  %s679_s5 = scalar_lea.hbm %s899_s9, 32  ;;  %s211_s11 = int_to_ptr.vmem [resolvable:$true] %s210_s11 }
  0x2f   : > { %p680_p10 = scmp.ne.s32.totalorder %s899_s9, %s679_s5  ;;  %s684_s18 = scalar_lea.hbm %s997_s1, 64 }
  0x30   : > { %p685_p12 = scmp.lt.u32.totalorder %s899_s9, %s997_s1  ;;  %p686_p0 = scmp.lt.u32.totalorder %s684_s18, %s679_s5 }
  0x31   : > { %p682_p11 = pnand %p680_p10, %p651_p13  ;;  %p688_p3 = scmp.lt.u32.totalorder %s679_s5, %s899_s9 }
  0x32   : > { %p687_p2 = por %p686_p0, %p685_p12 }
  0x33   : > { %p683_p8 = pneg %p682_p11 }
  0x34   : > { %p689_p4 = por %p688_p3, %p687_p2 }
  0x36   : > { %p690_p1 = pnand %p689_p4, %p683_p8 }
  0x38   : > { %693 = shalt.err (!%p690_p1)
}
  0x39   : > { %s694_s25 = scalar_lea.vmem %s211_s11, 32  ;;  %s766_s22 = smov [#allocation6]  }
  0x3a   : > { %p695_p5 = scmp.ne.s32.totalorder %s211_s11, %s694_s25  ;;  %s699_s26 = sshll.u32 %s766_s22, 4  ;;  %s700_s26 = int_to_ptr.vmem [resolvable:$false] %s699_s26 }
  0x3b   : > { %s701_s28 = scalar_lea.vmem %s700_s26, 64  ;;  %p702_p7 = scmp.lt.s32.totalorder %s211_s11, %s700_s26 }
  0x3c   : > { %p697_p10 = pnand %p695_p5, %p651_p13  ;;  %p703_p6 = scmp.lt.s32.totalorder %s701_s28, %s694_s25 }
  0x3e   : > { %p698_p11 = pneg %p697_p10  ;;  %p704_p0 = por %p703_p6, %p702_p7 }
  0x40   : > { %p705_p12 = pnand %p704_p0, %p698_p11 }
  0x42   : > { %708 = shalt.err (!%p705_p12)
}
  0x43   : > { %590 = dma.hbm_to_vmem [thread:$0]  (!%p852_p9), %s899_s9, 32, %s211_s11, %s196_s30  }
  0x44   : > { %p1007_p8 = scmp.ne.s32.totalorder %s1006_s27, 0 }
  0x45   : > { %s221_s29 = sand.u32 (!%p1007_p8), 1, %s747_s13   ;;  %p1008_p13 = scmp.ne.s32.totalorder (!%p1007_p8), %s1002_s23, 0 }
  0x46   : > { %219 = sbr.rel (%p1007_p8) target bundleno = 308 (0x134), region = 28  ;;  %s572_s4 = sshll.u32 (!%p1007_p8), %s221_s29, 3 }
  0x47   : > { %s222_s8 = scalar_lea.sflag (!%p1007_p8), [#allocation5], %s221_s29  ;;  %s225_s10 = scalar_lea.vmem (!%p1007_p8), [#allocation4], %s572_s4 }
  0x4d   : > { %734 = dma.done.wait (%p1008_p13), %s222_s8, 128  }
  0x4e   : > { %736 = vsyncadd (%p1008_p13), %s222_s8, 4294967168  ;;  %s573_s5 = sshll.u32 %s221_s29, 1  ;;  %s231_s7 = scalar_lea.sflag [#allocation7], %s221_s29 }
  0x4f   : > { %s234_s6 = scalar_lea.vmem [#allocation6], %s573_s5 }
  0x50   : > { %738 = dma.done.wait (%p1008_p13), %s231_s7, 32  }
  0x51   : > { %740 = vsyncadd (%p1008_p13), %s231_s7, 4294967264  ;;  %vm293_vm0 = vcmask 3072   ;;  %v348_v0 = vlaneseq  ;;  %v767_v1 = vmov 0   ;;  %vm300_vm1 = vcmask 1043456   ;;  %v350_v5 = vld [vmem:[%s234_s6] sm:$0x3] }
  0x52   : > { %295 = vst.msk [vmem:[#allocation3] sm:$0xf] %vm293_vm0, %v767_v1  ;;  %v296_v6 = vld [vmem:[%s225_s10] sm:$0xff]  ;;  %v768_v51 = vmov 0.0   ;;  %p275_p7 = scmp.lt.s32.totalorder %s755_s15, 1 }
  0x53   : > { %v933_v2 = vshrl.u32 %v348_v0, 7  ;;  %v298_v9 = vcombine.high %v296_v6, %v296_v6  ;;  %v301_v10 = vsel %vm300_vm1, %v296_v6, -inf  ;;  %294 = vst.msk [vmem:[#allocation2] sm:$0xf] %vm293_vm0, %v768_v51 }
  0x54   : > { %v302_v11 = vrot.slane %v301_v10, 4  ;;  %s1017_s15 = smov (!%p275_p7, %s755_s15), 1 }
  0x55   : > { %v353_v3 = vsub.s32 0, %v933_v2  ;;  %v357_v4 = vsub.s32 1, %v933_v2  ;;  %v308_v12 = vsel %vm300_vm1, %v298_v9, -inf  ;;  %s574_s23 = sshll.u32 %s1017_s15, 2 }
  0x56   : > { %v303_v15 = vmax.f32 %v301_v10, %v302_v11  ;;  %v309_v16 = vrot.slane %v308_v12, 4  ;;  %s288_s11 = scalar_lea.vmem %s999_s3, %s574_s23  ;;  %s281_s18 = scalar_lea.vmem %s998_s2, %s574_s23 }
  0x57   : > { %v937_v7 = vrot.slane %v350_v5, %v353_v3  ;;  %v939_v8 = vrot.slane %v350_v5, %v357_v4 }
  0x58   : > { %v304_v20 = vrot.slane %v303_v15, 2  ;;  %v310_v21 = vmax.f32 %v308_v12, %v309_v16 }
  0x59   : > { %vm359_vm2 = vcmp.eq.s32.totalorder %v933_v2, %v937_v7  ;;  %vm360_vm3 = vcmp.eq.s32.totalorder %v933_v2, %v939_v8  ;;  %v376_v10 = vld [vmem:[#allocation3] sm:$0xf] }
  0x5a   : > { %v377_v13 = vsel %vm359_vm2, 1, %v767_v1  ;;  %v378_v14 = vsel %vm360_vm3, 1, %v767_v1  ;;  %v305_v24 = vmax.f32 %v303_v15, %v304_v20  ;;  %v311_v25 = vrot.slane %v310_v21, 2  ;;  %v361_v8 = vld [vmem:[#allocation2] sm:$0xf] }
  0x5b   : > { %v379_v17 = vsel %vm300_vm1, %v377_v13, 0  ;;  %v380_v18 = vsel %vm300_vm1, %v378_v14, 0 }
  0x5c   : > { %v381_v19 = vadd.s32 %v380_v18, %v379_v17  ;;  %v306_v27 = vrot.slane %v305_v24, 1  ;;  %v312_v28 = vmax.f32 %v310_v21, %v311_v25 }
  0x5e   : > { %v383_v22 = vshrl.u32 %v381_v19, 16  ;;  %v382_v23 = vand.u32 65535, %v381_v19  ;;  %v307_v30 = vmax.f32 %v305_v24, %v306_v27  ;;  %v313_v31 = vrot.slane %v312_v28, 1 }
  0x60   : > { %v385_v26 = vcvt.s32.f32 %v383_v22  ;;  %v384_v29 = vcvt.s32.f32 %v382_v23  ;;  %v314_v32 = vmax.f32 %v312_v28, %v313_v31 }
  0x62   : > { %388 = vadd.xlane.f32.xlu0 %v385_v26  ;;  %v317_v33 = vcombine.low %v307_v30, %v314_v32 }
  0x64   : > { %v319_v34 = vsub.f32 %v296_v6, %v317_v33 }
  0x66   : > { %386 = vadd.xlane.f32.xlu0 %v384_v29  ;;  %v320_v35 = vmul.f32 1.442695, %v319_v34 }
  0x68   : > { %643 = vpow2.f32 %v320_v35 }
  0x72   : > { %v644_v36 = vpop.eup %643 }
  0x73   : > { %v323_v37 = vcombine.high %v644_v36, %v644_v36  ;;  %v325_v38 = vsel %vm300_vm1, %v644_v36, 0.0 }
  0x74   : > { %v326_v39 = vrot.slane %v325_v38, 4 }
  0x75   : > { %v332_v40 = vsel %vm300_vm1, %v323_v37, 0.0 }
  0x76   : > { %v327_v41 = vadd.f32 %v326_v39, %v325_v38  ;;  %v333_v42 = vrot.slane %v332_v40, 4 }
  0x78   : > { %v328_v43 = vrot.slane %v327_v41, 2  ;;  %v334_v44 = vadd.f32 %v333_v42, %v332_v40 }
  0x7a   : > { %v329_v45 = vadd.f32 %v328_v43, %v327_v41  ;;  %v335_v46 = vrot.slane %v334_v44, 2 }
  0x7c   : > { %v330_v47 = vrot.slane %v329_v45, 1  ;;  %v336_v48 = vadd.f32 %v335_v46, %v334_v44 }
  0x7e   : > { %v331_v49 = vadd.f32 %v330_v47, %v329_v45  ;;  %v337_v50 = vrot.slane %v336_v48, 1 }
  0x80   : > { %v338_v52 = vadd.f32 %v337_v50, %v336_v48  ;;  %645 = vlog2.f32 %v331_v49 }
  0x82   : > { %647 = vlog2.f32 %v338_v52 }
  0x8a   : > { %v646_v53 = vpop.eup %645 }
  0x8b   : > { %v340_v54 = vmul.f32 0.6931472, %v646_v53 }
  0x8c   : > { %v648_v55 = vpop.eup %647 }
  0x8d   : > { %v342_v56 = vmul.f32 0.6931472, %v648_v55 }
  0x8f   : > { %v345_v57 = vcombine.low %v340_v54, %v342_v56 }
  0x91   : > { %v347_v58 = vsub.f32 %v319_v34, %v345_v57 }
  0x93   : > { %v362_v59 = vsub.f32 0.0, %v347_v58 }
  0x95   : > { %v364_v60 = vcombine.high %v362_v59, %v362_v59  ;;  %v366_v61 = vsel %vm359_vm2, %v362_v59, 0.0 }
  0x96   : > { %v368_v62 = vsel %vm300_vm1, %v366_v61, 0.0 }
  0x97   : > { %v367_v63 = vsel %vm360_vm3, %v364_v60, 0.0 }
  0x98   : > { %v369_v0 = vsel %vm300_vm1, %v367_v63, 0.0 }
  0x99   : > { %v370_v1 = vadd.f32 %v369_v0, %v368_v62 }
  0x9b   : > { %371 = vadd.xlane.f32.xlu1 %v370_v1 }
  0xef   : > { %v389_v3 = vpop.xlane.xlu0 %388 }
  0xf0   : > { %v391_v4 = vcvt.f32.s32 %v389_v3 }
  0xf2   : > { %v392_v5 = vshll.u32 %v391_v4, 16 }
  0xf3   : > { %v387_v6 = vpop.xlane.xlu0 %386 }
  0xf4   : > { %v390_v9 = vcvt.f32.s32 %v387_v6 }
  0xf6   : > { %v393_v11 = vadd.s32 %v392_v5, %v390_v9 }
  0xf8   : > { %v394_v7 = vadd.s32 %v393_v11, %v376_v10 }
  0xfa   : > { %395 = vst.msk [vmem:[#allocation3] sm:$0xf] %vm293_vm0, %v394_v7 }
 0x101   : > { %v401_v2 = vld [vmem:[#allocation3] sm:$0xf] }
 0x102   : > { %402 = vst.msk [vmem:[%s288_s11] sm:$0xf] %vm293_vm0, %v401_v2 }
 0x128   : > { %v372_v12 = vpop.xlane.xlu1 %371 }
 0x129   : > { %v373_v13 = vadd.f32 %v372_v12, %v361_v8 }
 0x12b   : > { %375 = vst.msk [vmem:[#allocation2] sm:$0xf] %vm293_vm0, %v373_v13 }
 0x132   : > { %v399_v14 = vld [vmem:[#allocation2] sm:$0xf] }
 0x133   : > { %400 = vst.msk [vmem:[%s281_s18] sm:$0xf] %vm293_vm0, %v399_v14 }
 0x134 PF: > { %s20_s17 = sadd.s32 1, %s763_s17   ;;  %s1009_s12 = smov %s747_s13 }
 0x135   : > { %p17_p9 = scmp.ge.s32.totalorder %s20_s17, 4   ;;  %s1010_s13 = smov %s751_s14 }
 0x136   : > { %s1011_s14 = smov %s838_s24  ;;  %s1012_s15 = smov %s759_s16 }
 0x137   : > { %s1013_s16 = smov %s1015_s19  ;;  %19 = sbr.rel (!%p17_p9) target bundleno = 6 (0x6), region = 101 }
 0x13e   :  { %448 = vsyncpa [#allocation5], 1 }
 0x13f   :  { %450 = vsyncpa [#allocation5 + $0x1], 1 }
 0x140   :  { %451 = vsyncpa [#allocation7], 1 }
 0x141   :  { %453 = vsyncpa [#allocation7 + $0x1], 1 }

</bundles_post_ra>
